<compile_context>
chip_gen: v5e
topology: v5e:2x2
jax: 0.10.0
libtpu: 0.0.40
codegen_flags: <defaults>
</compile_context>

<pallas_src>
import functools

import jax
import jax.numpy as jnp
import numpy as np
from jax.experimental import pallas as pl
from jax.experimental.pallas import tpu as pltpu


def _silu(x):
    return x * jax.nn.sigmoid(x)


# ---------------------------------------------------------------------------
# Path A: single-pass kernel.  One grid step = one batch block; the whole
# (C, HW) slab of each image in the block is resident, so pool + gate + scale
# happen in one shot.  HW sits on the lane axis -> lane-dense load/store.
# ---------------------------------------------------------------------------
def _se_single_pass_kernel(x_ref, w1_ref, b1_ref, w2_ref, b2_ref, out_ref):
    x = x_ref[...].astype(jnp.float32)                    # (nb, C, HW)
    nb, C, _ = x.shape

    # squeeze: global average pool over H*W (lane-axis reduction)
    pooled = jnp.mean(x, axis=-1, keepdims=True).reshape(nb, C)

    # excitation: two 1x1 convs as 2-D MXU dots (math in f32)
    s1 = _silu(jnp.dot(pooled, w1_ref[...],
                       preferred_element_type=jnp.float32) + b1_ref[...])
    gate = jax.nn.sigmoid(jnp.dot(s1, w2_ref[...],
                                  preferred_element_type=jnp.float32) + b2_ref[...])

    # scale: broadcast gate along lanes; store stays lane-dense
    out_ref[...] = (x * gate.reshape(nb, C, 1)).astype(out_ref.dtype)


# ---------------------------------------------------------------------------
# Path B: two-pass HW-strip kernel (image slab too big for one VMEM block).
# grid = (batch blocks, 2 passes, HW strips):
#   pass 0: accumulate the HW sum strip by strip; at the last strip compute the
#           gate from sum / (H*W)   (a true mean, not per-strip means).
#   pass 1: re-stream the strips and write x * gate.
# Output index_map (n, 0, s*p) keeps the output block pinned during pass 0 so
# nothing un-written is ever flushed to HBM; every output strip is written
# exactly once (in pass 1).
# ---------------------------------------------------------------------------
def _se_two_pass_kernel(hw_total, x_ref, w1_ref, b1_ref, w2_ref, b2_ref,
                        out_ref, sum_ref, gate_ref):
    p = pl.program_id(1)
    s = pl.program_id(2)
    last_strip = pl.num_programs(2) - 1

    @pl.when((p == 0) & (s == 0))
    def _init():
        sum_ref[...] = jnp.zeros_like(sum_ref)

    @pl.when(p == 0)
    def _accumulate():
        x = x_ref[...].astype(jnp.float32)                 # (nb, C, hw_blk)
        sum_ref[...] += jnp.sum(x, axis=-1, keepdims=True)

    @pl.when((p == 0) & (s == last_strip))
    def _gate():
        nb, C, _ = sum_ref.shape
        pooled = sum_ref[...].reshape(nb, C) * (1.0 / hw_total)
        s1 = _silu(jnp.dot(pooled, w1_ref[...],
                           preferred_element_type=jnp.float32) + b1_ref[...])
        g = jax.nn.sigmoid(jnp.dot(s1, w2_ref[...],
                                   preferred_element_type=jnp.float32) + b2_ref[...])
        gate_ref[...] = g.reshape(nb, C, 1)

    @pl.when(p == 1)
    def _scale():
        x = x_ref[...].astype(jnp.float32)
        out_ref[...] = (x * gate_ref[...]).astype(out_ref.dtype)


# ---------------------------------------------------------------------------
# Block sizing helpers.
# ---------------------------------------------------------------------------
def _pick_batch_block(N, per_image_bytes, target_bytes):
    """Largest nb dividing N with nb*per_image_bytes <= target_bytes, while
    keeping >= 2 grid steps whenever N >= 2 (v7x 2-TC sharding + pipelining)."""
    best = 1
    for nb in range(1, N + 1):
        if N % nb:
            continue
        if nb * per_image_bytes > target_bytes:
            continue
        if N >= 2 and N // nb < 2:
            continue
        best = nb
    return best


def _pick_hw_strip(HW, bytes_per_hw, target_bytes):
    """Largest multiple-of-128 strip dividing HW whose block fits target_bytes."""
    best = None
    if HW % 128 == 0:
        for m in range(1, HW // 128 + 1):
            hw_blk = 128 * m
            if HW % hw_blk == 0 and hw_blk * bytes_per_hw <= target_bytes:
                best = hw_blk
    if best is None:
        # TODO(synk): masked partial strips for H*W not divisible by 128.
        best = 128 if HW % 128 == 0 else HW
    return best


# ---------------------------------------------------------------------------
# Wrapper.
# ---------------------------------------------------------------------------
def squeeze_excitation_pallas(x_nchw, params, *, block_bytes_target=2 << 20):
    """x_nchw: (N, C, H, W), f32 or bf16.
       params = (w1, b1, w2, b2): (C, R), (1, R), (R, C), (1, C)
       (1x1 conv weights pre-transposed for (nb, C) @ (C, R) dots).
       Returns (N, C, H, W) in x's dtype."""
    w1, b1, w2, b2 = params
    N, C, H, W = x_nchw.shape
    HW = H * W
    dtype = x_nchw.dtype
    itemsize = jnp.dtype(dtype).itemsize

    # Pure contiguous view (no transpose): H*W lands on the 128-lane axis.
    x = x_nchw.reshape(N, C, HW)
    per_image_bytes = C * HW * itemsize

    def full_spec(arr):
        shape = arr.shape
        return pl.BlockSpec(shape, lambda *_: (0,) * len(shape))

    weight_args = (w1, b1, w2, b2)
    weight_specs = [full_spec(a) for a in weight_args]

    if per_image_bytes <= block_bytes_target:
        # ---- Path A: single pass, block over batch -------------------------
        nb = _pick_batch_block(N, per_image_bytes, block_bytes_target)
        block_bytes = nb * per_image_bytes
        # ~2x in + 2x out blocks (double buffering) + margin; cap for v7x 64 MiB.
        vmem_limit = int(min(64 << 20, max(16 << 20, 5 * block_bytes)))

        out = pl.pallas_call(
            _se_single_pass_kernel,
            out_shape=jax.ShapeDtypeStruct((N, C, HW), dtype),
            grid=(N // nb,),
            in_specs=[pl.BlockSpec((nb, C, HW), lambda n: (n, 0, 0))] + weight_specs,
            out_specs=pl.BlockSpec((nb, C, HW), lambda n: (n, 0, 0)),
            compiler_params=pltpu.CompilerParams(
                dimension_semantics=("parallel",),
                vmem_limit_bytes=vmem_limit),
        )(x, *weight_args)
    else:
        # ---- Path B: two-pass HW strips, one image per batch block ---------
        nb = 1
        hw_blk = _pick_hw_strip(HW, nb * C * itemsize, block_bytes_target)
        n_strips = HW // hw_blk
        block_bytes = nb * C * hw_blk * itemsize
        vmem_limit = int(min(64 << 20, max(16 << 20, 5 * block_bytes)))

        out = pl.pallas_call(
            functools.partial(_se_two_pass_kernel, float(HW)),
            out_shape=jax.ShapeDtypeStruct((N, C, HW), dtype),
            grid=(N // nb, 2, n_strips),
            in_specs=[pl.BlockSpec((nb, C, hw_blk),
                                   lambda n, p, s: (n, 0, s))] + weight_specs,
            out_specs=pl.BlockSpec((nb, C, hw_blk),
                                   lambda n, p, s: (n, 0, s * p)),
            scratch_shapes=[pltpu.VMEM((nb, C, 1), jnp.float32),   # running sum
                            pltpu.VMEM((nb, C, 1), jnp.float32)],  # gate
            compiler_params=pltpu.CompilerParams(
                dimension_semantics=("parallel", "arbitrary", "arbitrary"),
                vmem_limit_bytes=vmem_limit),
        )(x, *weight_args)

    return out.reshape(N, C, H, W)


# ---------------------------------------------------------------------------
# Deterministic parameters (mirrors nn.Conv2d(n_in, R, 1) / nn.Conv2d(R, n_in, 1)).
# ---------------------------------------------------------------------------
def make_params(key, n_in, reduced_dim):
    k1, k2, k3, k4 = jax.random.split(key, 4)
    w1 = 0.3 * jax.random.normal(k1, (n_in, reduced_dim), jnp.float32)
    b1 = 0.1 * jax.random.normal(k2, (1, reduced_dim), jnp.float32)
    w2 = 0.3 * jax.random.normal(k3, (reduced_dim, n_in), jnp.float32)
    b2 = 0.1 * jax.random.normal(k4, (1, n_in), jnp.float32)
    return w1, b1, w2, b2


# ---------------------------------------------------------------------------
# Pure-JAX reference (correctness asserts only).
# ---------------------------------------------------------------------------
def squeeze_excitation_reference(x, params):
    w1, b1, w2, b2 = params
    xf = x.astype(jnp.float32)
    pooled = jnp.mean(xf, axis=(2, 3))                    # AdaptiveAvgPool2d(1)
    s1 = _silu(pooled @ w1 + b1)                          # Conv2d(C, R, 1) + SiLU
    gate = jax.nn.sigmoid(s1 @ w2 + b2)                   # Conv2d(R, C, 1) + Sigmoid
    return (xf * gate[:, :, None, None]).astype(x.dtype)  # x * y


if __name__ == "__main__":
    key = jax.random.PRNGKey(0)

    # --- 1) toy module shape, f32, single-pass path (grid=(2,) -> pipelined,
    #        v7x-shardable) ---------------------------------------------------
    N, C, H, W, R = 2, 4, 16, 16, 2
    kx, kp, key = jax.random.split(key, 3)
    x = jax.random.normal(kx, (N, C, H, W), jnp.float32)
    params = make_params(kp, C, R)
    out = jax.block_until_ready(squeeze_excitation_pallas(x, params))
    ref = squeeze_excitation_reference(x, params)
    np.testing.assert_allclose(np.asarray(out), np.asarray(ref), rtol=1e-5, atol=1e-5)

    # --- 2) force the two-pass HW-strip path (large-image scheme) ------------
    N2, C2, H2, W2, R2 = 2, 8, 32, 32, 4
    kx2, kp2, key = jax.random.split(key, 3)
    x2 = jax.random.normal(kx2, (N2, C2, H2, W2), jnp.float32)
    params2 = make_params(kp2, C2, R2)
    out2 = jax.block_until_ready(
        squeeze_excitation_pallas(x2, params2, block_bytes_target=16 * 1024))
    ref2 = squeeze_excitation_reference(x2, params2)
    np.testing.assert_allclose(np.asarray(out2), np.asarray(ref2), rtol=1e-5, atol=1e-5)

    # --- 3) bf16 activations (halves HBM bytes; gate math stays f32) ---------
    x3 = x.astype(jnp.bfloat16)
    out3 = jax.block_until_ready(squeeze_excitation_pallas(x3, params))
    ref3 = squeeze_excitation_reference(x3, params)
    np.testing.assert_allclose(np.asarray(out3, dtype=np.float32),
                               np.asarray(ref3, dtype=np.float32),
                               rtol=2e-2, atol=2e-2)

    print("KERNEL_OK")
</pallas_src>

<mosaic_0001>
module attributes {stable_mosaic.version = 11 : i64} {
  func.func @_se_single_pass_kernel(%arg0: i32, %arg1: memref<1x4x256xf32, #tpu.memory_space<vmem>>, %arg2: memref<4x2xf32, #tpu.memory_space<vmem>>, %arg3: memref<1x2xf32, #tpu.memory_space<vmem>>, %arg4: memref<2x4xf32, #tpu.memory_space<vmem>>, %arg5: memref<1x4xf32, #tpu.memory_space<vmem>>, %arg6: memref<1x4x256xf32, #tpu.memory_space<vmem>>) attributes {dimension_semantics = [#tpu.dimension_semantics<parallel>], iteration_bounds = array<i64: 2>, scalar_prefetch = 0 : i64, scratch_operands = 0 : i64, tpu.core_type = #tpu.core_type<tc>, window_params = [{transform_indices = @transform_0, window_bounds = array<i64: 1, 4, 256>}, {pipeline_mode = #tpu.pipeline_mode<synchronous>, transform_indices = @transform_1, window_bounds = array<i64: 4, 2>}, {pipeline_mode = #tpu.pipeline_mode<synchronous>, transform_indices = @transform_2, window_bounds = array<i64: 1, 2>}, {pipeline_mode = #tpu.pipeline_mode<synchronous>, transform_indices = @transform_3, window_bounds = array<i64: 2, 4>}, {pipeline_mode = #tpu.pipeline_mode<synchronous>, transform_indices = @transform_4, window_bounds = array<i64: 1, 4>}, {transform_indices = @transform_5, window_bounds = array<i64: 1, 4, 256>}]} {
    %c0 = arith.constant 0 : index
    %c0_0 = arith.constant 0 : index
    %c0_1 = arith.constant 0 : index
    %0 = vector.load %arg1[%c0, %c0_0, %c0_1] : memref<1x4x256xf32, #tpu.memory_space<vmem>>, vector<1x4x256xf32>
    %cst = arith.constant dense<0.000000e+00> : vector<1x4xf32>
    %1 = vector.multi_reduction <add>, %0, %cst [2] : vector<1x4x256xf32> to vector<1x4xf32>
    %2 = vector.shape_cast %1 : vector<1x4xf32> to vector<1x4x1xf32>
    %cst_2 = arith.constant 2.560000e+02 : f32
    %3 = vector.broadcast %cst_2 : f32 to vector<1x4x1xf32>
    %4 = arith.divf %2, %3 : vector<1x4x1xf32>
    %5 = vector.shape_cast %4 : vector<1x4x1xf32> to vector<1x4xf32>
    %c0_3 = arith.constant 0 : index
    %c0_4 = arith.constant 0 : index
    %6 = vector.load %arg2[%c0_3, %c0_4] : memref<4x2xf32, #tpu.memory_space<vmem>>, vector<4x2xf32>
    %cst_5 = arith.constant dense<0.000000e+00> : vector<1x2xf32>
    %7 = tpu.matmul %5, %6, %cst_5 {dimension_numbers = #tpu.dot_dimension_numbers<[1], [0], [0], [1], [0, 0, 1, 1], [], []>} : vector<1x4xf32>, vector<4x2xf32>, vector<1x2xf32> -> vector<1x2xf32>
    %c0_6 = arith.constant 0 : index
    %c0_7 = arith.constant 0 : index
    %8 = vector.load %arg3[%c0_6, %c0_7] : memref<1x2xf32, #tpu.memory_space<vmem>>, vector<1x2xf32>
    %9 = arith.addf %7, %8 : vector<1x2xf32>
    %10 = arith.negf %9 : vector<1x2xf32>
    %11 = math.exp %10 : vector<1x2xf32>
    %cst_8 = arith.constant 1.000000e+00 : f32
    %12 = vector.broadcast %cst_8 : f32 to vector<1x2xf32>
    %13 = arith.addf %12, %11 : vector<1x2xf32>
    %14 = arith.divf %12, %13 : vector<1x2xf32>
    %15 = arith.mulf %9, %14 : vector<1x2xf32>
    %c0_9 = arith.constant 0 : index
    %c0_10 = arith.constant 0 : index
    %16 = vector.load %arg4[%c0_9, %c0_10] : memref<2x4xf32, #tpu.memory_space<vmem>>, vector<2x4xf32>
    %cst_11 = arith.constant dense<0.000000e+00> : vector<1x4xf32>
    %17 = tpu.matmul %15, %16, %cst_11 {dimension_numbers = #tpu.dot_dimension_numbers<[1], [0], [0], [1], [0, 0, 1, 1], [], []>} : vector<1x2xf32>, vector<2x4xf32>, vector<1x4xf32> -> vector<1x4xf32>
    %c0_12 = arith.constant 0 : index
    %c0_13 = arith.constant 0 : index
    %18 = vector.load %arg5[%c0_12, %c0_13] : memref<1x4xf32, #tpu.memory_space<vmem>>, vector<1x4xf32>
    %19 = arith.addf %17, %18 : vector<1x4xf32>
    %20 = arith.negf %19 : vector<1x4xf32>
    %21 = math.exp %20 : vector<1x4xf32>
    %cst_14 = arith.constant 1.000000e+00 : f32
    %22 = vector.broadcast %cst_14 : f32 to vector<1x4xf32>
    %23 = arith.addf %22, %21 : vector<1x4xf32>
    %24 = arith.divf %22, %23 : vector<1x4xf32>
    %25 = vector.shape_cast %24 : vector<1x4xf32> to vector<1x4x1xf32>
    %26 = vector.broadcast %25 : vector<1x4x1xf32> to vector<1x4x256xf32>
    %27 = arith.mulf %0, %26 : vector<1x4x256xf32>
    %c0_15 = arith.constant 0 : index
    %c0_16 = arith.constant 0 : index
    %c0_17 = arith.constant 0 : index
    %28 = vector.load %arg6[%c0_15, %c0_16, %c0_17] : memref<1x4x256xf32, #tpu.memory_space<vmem>>, vector<1x4x256xf32>
    tpu.vector_store %arg6[%c0_15, %c0_16, %c0_17], %27 {strides = array<i32>} : memref<1x4x256xf32, #tpu.memory_space<vmem>>, vector<1x4x256xf32>,
    return
  }
  func.func @transform_0(%arg0: i32) -> (i32, i32, i32) {
    %c0_i32 = arith.constant 0 : i32
    %c0_i32_0 = arith.constant 0 : i32
    %c0_i32_1 = arith.constant 0 : i32
    return %arg0, %c0_i32, %c0_i32_0 : i32, i32, i32
  }
  func.func @transform_1(%arg0: i32) -> (i32, i32) {
    %c0_i32 = arith.constant 0 : i32
    %c0_i32_0 = arith.constant 0 : i32
    %c0_i32_1 = arith.constant 0 : i32
    return %c0_i32, %c0_i32_0 : i32, i32
  }
  func.func @transform_2(%arg0: i32) -> (i32, i32) {
    %c0_i32 = arith.constant 0 : i32
    %c0_i32_0 = arith.constant 0 : i32
    %c0_i32_1 = arith.constant 0 : i32
    return %c0_i32, %c0_i32_0 : i32, i32
  }
  func.func @transform_3(%arg0: i32) -> (i32, i32) {
    %c0_i32 = arith.constant 0 : i32
    %c0_i32_0 = arith.constant 0 : i32
    %c0_i32_1 = arith.constant 0 : i32
    return %c0_i32, %c0_i32_0 : i32, i32
  }
  func.func @transform_4(%arg0: i32) -> (i32, i32) {
    %c0_i32 = arith.constant 0 : i32
    %c0_i32_0 = arith.constant 0 : i32
    %c0_i32_1 = arith.constant 0 : i32
    return %c0_i32, %c0_i32_0 : i32, i32
  }
  func.func @transform_5(%arg0: i32) -> (i32, i32, i32) {
    %c0_i32 = arith.constant 0 : i32
    %c0_i32_0 = arith.constant 0 : i32
    %c0_i32_1 = arith.constant 0 : i32
    return %arg0, %c0_i32, %c0_i32_0 : i32, i32, i32
  }
}

</mosaic_0001>

<bundles_post_ra>
// kernel: tpu_custom_call.1
= control target key start
LH: loop header
LB: loop body
LE: loop exit
PB: predicated region body
PF: predicated region fallthrough
CT: control target
= control target key end

     0   :  { %10 = vsyncpa [#allocation3], 0  ;;  %s825_s0 = inlined_call_operand.hbm [shape: f32[2,4,256], index: 0, kind: input, shape index: {}]   ;;  %s826_s1 = inlined_call_operand.vmem [shape: f32[4,2], index: 1, kind: input, shape index: {}]   ;;  %s827_s2 = inlined_call_operand.vmem [shape: f32[1,2], index: 2, kind: input, shape index: {}]   ;;  %s828_s3 = inlined_call_operand.vmem [shape: f32[2,4], index: 3, kind: input, shape index: {}]   ;;  %s829_s4 = inlined_call_operand.vmem [shape: f32[1,4], index: 4, kind: input, shape index: {}]   ;;  %s830_s5 = inlined_call_operand.hbm [shape: f32[2,4,256], index: 5, kind: output, shape index: {}]  }
   0x1   :  { %12 = vsyncpa [#allocation3 + $0x1], 0 }
   0x2   :  { %13 = vsyncpa [#allocation4], 0 }
   0x3   :  { %15 = vsyncpa [#allocation4 + $0x1], 0  ;;  %s678_s18 = smov 0   ;;  %s680_s19 = smov 0  }
   0x4   :  { %s682_s20 = smov 0   ;;  %s684_s21 = smov 0  }
   0x5 LB: > { %s699_s22 = sadd.s32 4294967295, %s644_s21   ;;  %s467_s23 = sadd.s32 4294967294, %s644_s21   ;;  %s644_s21 = sphi %s684_s21, %s840_s21   ;;  %s640_s20 = sphi %s682_s20, %s839_s20   ;;  %s636_s19 = sphi %s680_s19, %s838_s19   ;;  %s632_s18 = sphi %s678_s18, %s837_s18  }
   0x6   : > { %s703_s24 = sadd.s32 1, %s644_s21   ;;  %s28_s25 = sadd.s32 1, %s640_s20 }
   0x7   : > { %s25_s26 = ssub.s32 %s644_s21, %s703_s24  ;;  %p35_p0 = scmp.ne.s32.totalorder %s640_s20, %s636_s19 }
   0x8   : > { %p26_p1 = scmp.eq.s32.totalorder %s25_s26, 0  ;;  %p36_p2 = scmp.eq.s32.totalorder %s644_s21, 0 }
   0x9   : > { %p41_p3 = scmp.ne.s32.totalorder %s636_s19, %s632_s18  ;;  %p42_p4 = scmp.eq.s32.totalorder %s699_s22, 0 }
   0xa   : > { %s715_s27 = scalar_select %p26_p1, %s640_s20, %s28_s25  }
   0xb   : > { %p717_p5 = por %p36_p2, %p35_p0  ;;  %p721_p6 = por %p42_p4, %p41_p3 }
   0xc   : > { %p149_p7 = scmp.eq.s32.totalorder %s699_s22, 1  ;;  %p155_p8 = scmp.eq.s32.totalorder %s467_s23, 1 }
   0xd   : > { %p501_p10 = scmp.lt.s32.totalorder %s644_s21, 2  ;;  %s187_s7 = sand.u32 1, %s640_s20  }
   0xe   : > { %p728_p11 = por %p149_p7, %p35_p0  ;;  %p732_p12 = por %p155_p8, %p41_p3 }
   0xf   : > { %s487_s8 = sshll.u32 %s644_s21, 3  ;;  %s470_s9 = sshll.u32 %s187_s7, 3 }
  0x10   : > { %s196_s12 = scalar_lea.hbm %s825_s0, %s487_s8  ;;  %s191_s14 = scalar_lea.vmem [#allocation2], %s470_s9 }
  0x11   : > { %s198_s13 = sshll.u32 %s196_s12, 4  ;;  %s200_s15 = sshll.u32 %s191_s14, 4  ;;  %s199_s13 = int_to_ptr.hbm [resolvable:$true] %s198_s13  ;;  %s201_s15 = int_to_ptr.vmem [resolvable:$true] %s200_s15 }
  0x12   : > { %p743_p13 = pnand %p501_p10, %p717_p5  ;;  %p473_p0 = scmp.ge.s32.totalorder %s644_s21, 1 }
  0x13   : > { %p205_p1 = scmp.lt.s32.totalorder %s644_s21, 3  ;;  %s188_s17 = scalar_lea.sflag [#allocation3], %s187_s7 }
  0x14   : > { %s548_s23 = sshra.s32 %s199_s13, 4  ;;  %p552_p3 = pneg %p743_p13  ;;  %s549_s23 = int_to_ptr.hbm [resolvable:$true] %s548_s23 }
  0x15   : > { %s550_s25 = scalar_lea.hbm %s549_s23, 8  ;;  %s555_s28 = scalar_lea.hbm %s825_s0, 16 }
  0x16   : > { %p551_p2 = scmp.ne.s32.totalorder %s549_s23, %s550_s25  ;;  %p556_p5 = scmp.lt.s32.totalorder %s549_s23, %s825_s0 }
  0x17   : > { %p557_p8 = scmp.lt.s32.totalorder %s555_s28, %s550_s25 }
  0x18   : > { %p553_p4 = pnand %p552_p3, %p551_p2 }
  0x19   : > { %p558_p10 = por %p557_p8, %p556_p5 }
  0x1a   : > { %p554_p7 = pneg %p553_p4 }
  0x1c   : > { %p559_p9 = pnand %p558_p10, %p554_p7 }
  0x1e   : > { %562 = shalt.err (!%p559_p9)
}
  0x1f   : > { %496 = dma.hbm_to_vmem [thread:$0]  (!%p743_p13), %s199_s13, 128, %s201_s15, %s188_s17  }
  0x20   : > { %p206_p2 = pnand %p473_p0, %p205_p1 }
  0x21   : > { %s764_s7 = sand.u32 (!%p206_p2), 1, %s636_s19  }
  0x22   : > { %209 = sbr.rel (%p206_p2) target bundleno = 610 (0x262), region = 40  ;;  %s474_s11 = sshll.u32 (!%p206_p2), %s764_s7, 3 }
  0x23   : > { %s212_s12 = scalar_lea.sflag (!%p206_p2), [#allocation3], %s764_s7  ;;  %s215_s14 = scalar_lea.vmem (!%p206_p2), [#allocation2], %s474_s11 }
  0x27   : > { %623 = dma.done.wait (%p721_p6), %s212_s12, 128  }
  0x28   : > { %625 = vsyncadd (%p721_p6), %s212_s12, 4294967168  ;;  %v774_v0 = vld [vmem:[%s215_s14] sm:$0xff]  ;;  %vm250_vm0 = vcmask 1043456   ;;  %v264_v6 = vld [vmem:[%s826_s1] sm:$0xf]  ;;  %v646_v7 = vmov 256.0   ;;  %v267_v13 = vlaneseq }
  0x29   : > { %245 = vst [vmem:[#allocation1] ss:$2 sm:$0xff] %v774_v0  ;;  %476 = vmatpush.msk.msra.mxu0 %vm250_vm0, %v264_v6  ;;  %538 = vrcp.f32 %v646_v7  ;;  %vm270_vm2 = vcmask 31744   ;;  %v265_v19 = vld [vmem:[%s827_s2] sm:$0x1]  ;;  %vm322_vm3 = vcmask 1041408  }
  0x2a   : > { %v268_v15 = vand.u32 127, %v267_v13  ;;  %v316_v20 = vld [vmem:[%s828_s3] sm:$0x3]  ;;  %vm318_vm8 = vcmask 15360   ;;  %v367_v37 = vshrl.u32 %v267_v13, 7  ;;  %s488_s8 = sshll.u32 %s699_s22, 3 }
  0x2b   : > { %479 = vmatpush.msk.msra.mxu1 %vm322_vm3, %v316_v20  ;;  %v317_v38 = vld [vmem:[%s829_s4] sm:$0x1]  ;;  %v647_v55 = vmov 839922192   ;;  %s392_s10 = scalar_lea.hbm %s830_s5, %s488_s8  ;;  %s242_s12 = scalar_lea.vmem [#allocation5], %s474_s11 }
  0x2c   : > { %537 = vset.pattern.permute.xlu0 %v367_v37  ;;  %v374_v56 = vunpack.c.l.s4 %v647_v55  ;;  %s394_s14 = sshll.u32 %s242_s12, 4  ;;  %s396_s13 = sshll.u32 %s392_s10, 4  ;;  %s395_s14 = int_to_ptr.vmem [resolvable:$true] %s394_s14  ;;  %s397_s13 = int_to_ptr.hbm [resolvable:$true] %s396_s13 }
  0x2d   : > { %s381_s15 = scalar_lea.sflag [#allocation4], %s764_s7  ;;  %s592_s29 = sshra.s32 %s397_s13, 4  ;;  %s593_s29 = int_to_ptr.hbm [resolvable:$true] %s592_s29 }
  0x2e   : > { %v375_v57 = vunpack.c.0.s8 %v374_v56  ;;  %s594_s22 = scalar_lea.hbm %s593_s29, 8  ;;  %s598_s11 = scalar_lea.hbm %s830_s5, 16 }
  0x2f   : > { %v539_v8 = vpop.eup %538  ;;  %p595_p6 = scmp.ne.s32.totalorder %s593_s29, %s594_s22  ;;  %p599_p0 = scmp.lt.s32.totalorder %s593_s29, %s830_s5 }
  0x30   : > { %v246_v1 = vld.sshfl [vmem:[#allocation1] sm:$0xff pattern:$0x75316420]  ;;  %v247_v2 = vld.sshfl [vmem:[#allocation1 + $0x8] sm:$0xff pattern:$0x75316420]  ;;  %vm261_vm1 = vweird.f32 %v539_v8  ;;  %p600_p1 = scmp.lt.s32.totalorder %s598_s11, %s594_s22 }
  0x31   : > { %v251_v3 = vsel %vm250_vm0, %v246_v1, 0.0  ;;  %v252_v4 = vsel %vm250_vm0, %v247_v2, 0.0  ;;  %v257_v9 = vmul.f32 256.0, %v539_v8  ;;  %p596_p9 = pnand %p595_p6, %p728_p11 }
  0x32   : > { %v253_v5 = vadd.f32 %v252_v4, %v251_v3  ;;  %p601_p3 = por %p600_p1, %p599_p0 }
  0x33   : > { %v258_v10 = vsub.f32 1.0, %v257_v9  ;;  %p597_p13 = pneg %p596_p9 }
  0x34   : > { %254 = vadd.xlane.f32.xlu0 %v253_v5 }
  0x35   : > { %v259_v11 = vmul.f32 %v539_v8, %v258_v10  ;;  %p602_p4 = pnand %p601_p3, %p597_p13 }
  0x37   : > { %v260_v12 = vadd.f32 %v539_v8, %v259_v11 }
  0x39   : > { %v262_v14 = vsel %vm261_vm1, %v539_v8, %v260_v12 }
  0xa7   : > { %v255_v16 = vpop.xlane.xlu0 %254 }
  0xa8   : > { %v263_v17 = vmul.f32 %v262_v14, %v255_v16 }
  0xaa   : > { %v269_v18 = vperm.slane %v263_v17, %v268_v15 }
  0xac   : > { %477 = vmatmul.msk.f32.vlgmr.msra.gmra.mxu0 %vm270_vm2, %v269_v18 }
 0x129   : > { %v293_v21 = vpop.f32.mrf.mxu0 }
 0x12a   : > { %v294_v22 = vadd.f32 %v293_v21, %v265_v19 }
 0x12c   : > { %v478_v23 = vmul.f32 -1.442695, %v294_v22 }
 0x12e   : > { %540 = vpow2.f32 %v478_v23 }
 0x134   : > { %v541_v24 = vpop.eup %540 }
 0x135   : > { %v299_v25 = vadd.f32 1.0, %v541_v24 }
 0x137   : > { %542 = vrcp.f32 %v299_v25  ;;  %v311_v29 = vand.u32 2147483648, %v299_v25  ;;  %v309_v31 = vand.u32 2147483647, %v299_v25  ;;  %vm305_vm5 = vweird.f32 %v299_v25 }
 0x139   : > { %v312_v33 = vor.u32 1.1754944e-38, %v311_v29  ;;  %vm310_vm7 = vcmp.eq.f32.partialorder %v309_v31, 8.507059e+37 }
 0x13d   : > { %v543_v26 = vpop.eup %542 }
 0x13e   : > { %v301_v27 = vmul.f32 %v543_v26, %v299_v25  ;;  %vm306_vm4 = vweird.f32 %v543_v26 }
 0x13f   : > { %vm307_vm6 = vmor %vm305_vm5, %vm306_vm4 }
 0x140   : > { %v302_v28 = vsub.f32 1.0, %v301_v27 }
 0x142   : > { %v303_v30 = vmul.f32 %v543_v26, %v302_v28 }
 0x144   : > { %v304_v32 = vadd.f32 %v543_v26, %v303_v30 }
 0x146   : > { %v308_v34 = vsel %vm307_vm6, %v543_v26, %v304_v32 }
 0x147   : > { %v313_v35 = vsel %vm310_vm7, %v312_v33, %v308_v34 }
 0x148   : > { %v315_v36 = vmul.f32 %v313_v35, %v294_v22 }
 0x14a   : > { %480 = vmatmul.msk.f32.vlgmr.msra.gmra.mxu1 %vm318_vm8, %v315_v36 }
 0x1c7   : > { %v343_v39 = vpop.f32.mrf.mxu1 }
 0x1c8   : > { %v344_v40 = vadd.f32 %v343_v39, %v317_v38 }
 0x1ca   : > { %v481_v41 = vmul.f32 -1.442695, %v344_v40 }
 0x1cc   : > { %544 = vpow2.f32 %v481_v41 }
 0x1d2   : > { %v545_v42 = vpop.eup %544 }
 0x1d3   : > { %v349_v43 = vadd.f32 1.0, %v545_v42 }
 0x1d5   : > { %546 = vrcp.f32 %v349_v43  ;;  %v361_v47 = vand.u32 2147483648, %v349_v43  ;;  %v359_v49 = vand.u32 2147483647, %v349_v43  ;;  %vm355_vm10 = vweird.f32 %v349_v43 }
 0x1d7   : > { %v362_v51 = vor.u32 1.1754944e-38, %v361_v47  ;;  %vm360_vm12 = vcmp.eq.f32.partialorder %v359_v49, 8.507059e+37 }
 0x1db   : > { %v547_v44 = vpop.eup %546 }
 0x1dc   : > { %v351_v45 = vmul.f32 %v547_v44, %v349_v43  ;;  %vm356_vm9 = vweird.f32 %v547_v44 }
 0x1dd   : > { %vm357_vm11 = vmor %vm355_vm10, %vm356_vm9 }
 0x1de   : > { %v352_v46 = vsub.f32 1.0, %v351_v45 }
 0x1e0   : > { %v353_v48 = vmul.f32 %v547_v44, %v352_v46 }
 0x1e2   : > { %v354_v50 = vadd.f32 %v547_v44, %v353_v48 }
 0x1e4   : > { %v358_v52 = vsel %vm357_vm11, %v547_v44, %v354_v50 }
 0x1e5   : > { %v363_v53 = vsel %vm360_vm12, %v362_v51, %v358_v52 }
 0x1e6   : > { %v365_v54 = vperm.slane %v363_v53, 0 }
 0x1e8   : > { %370 = vperm.xlu0 %537, %v365_v54  }
 0x25a   : > { %v371_v58 = vpop.permute.xlu0 %370 }
 0x25b   : > { %v376_v59 = vperm.slane %v371_v58, %v375_v57 }
 0x25d   : > { %v378_v60 = vmul.f32 %v376_v59, %v774_v0 }
 0x25f   : > { %379 = vst [vmem:[%s242_s12] sm:$0xff] %v378_v60 }
 0x260   : > { %605 = shalt.err (!%p602_p4)
}
 0x261   : > { %491 = dma.vmem_to_hbm [thread:$0]  (%p728_p11), %s395_s14, 128, %s397_s13, %s381_s15  }
 0x262 PF: > { %s408_s7 = sand.u32 1, %s632_s18   ;;  %p836_p7 = scmp.ge.s32.totalorder %s644_s21, 2 }
 0x263   : > { %s409_s26 = scalar_lea.sflag [#allocation4], %s408_s7 }
 0x264   : > { %p498_p5 = pnand %p836_p7, %p732_p12 }
 0x266   : > { %p499_p8 = pneg %p498_p5 }
 0x268   : > { %627 = dma.done.wait (%p499_p8), %s409_s26, 128  }
 0x269   : > { %629 = vsyncadd (%p499_p8), %s409_s26, 4294967168  ;;  %p18_p10 = scmp.ge.s32.totalorder %s703_s24, 4   ;;  %s837_s18 = smov %s636_s19 }
 0x26a   : > { %s838_s19 = smov %s640_s20  ;;  %s839_s20 = smov %s715_s27 }
 0x26b   : > { %s840_s21 = smov %s703_s24  ;;  %20 = sbr.rel (!%p18_p10) target bundleno = 5 (0x5), region = 85 }
 0x270   :  { %415 = vsyncpa [#allocation3], 1 }
 0x271   :  { %417 = vsyncpa [#allocation3 + $0x1], 1 }
 0x272   :  { %418 = vsyncpa [#allocation4], 1 }
 0x273   :  { %420 = vsyncpa [#allocation4 + $0x1], 1 }

</bundles_post_ra>
